<compile_context>
chip_gen: v7x
topology: tpu7x:2x2x1
jax: 0.10.0
libtpu: 0.0.40
codegen_flags: <defaults>
</compile_context>

<pallas_src>
import functools

import numpy as np
import jax
import jax.numpy as jnp
from jax.experimental import pallas as pl
from jax.experimental.pallas import tpu as pltpu


def _round_up(x, m):
    return (x + m - 1) // m * m


def _densenet_kernel(x_ref, wx_ref, bx_ref, w_ref, b_ref, out_ref, *, hidden_depth):
    """x_ref: (tb, n_ind_pad) f32; wx_ref: (n_ind_pad, P) f32; bx_ref: (1, P) f32;
    w_ref: (hidden_depth+1, P, P) bf16; b_ref: (hidden_depth+1, 1, P) f32."""
    x = x_ref[...]                                              # (tb, n_ind_pad) f32

    # Fused input_layer + single_layer (skip): one small-K f32 matmul.
    #   columns [0, n_dep)              -> single_layer(x)   (skip, pre-activation)
    #   columns [n_dep, n_dep+n_hidden) -> input_layer(x)
    z0 = jnp.dot(x, wx_ref[...], preferred_element_type=jnp.float32) + bx_ref[...]

    # tanh over the whole slab is safe: the "skip" columns feed only zero rows of
    # the next weight slab, so their tanh'd values never propagate.
    y = jnp.tanh(z0)                                            # (tb, P) f32

    def linear(v, li):
        w = w_ref[li]                                           # (P, P) bf16, static slice
        b = b_ref[li]                                           # (1, P) f32
        return jnp.dot(v.astype(jnp.bfloat16), w,
                       preferred_element_type=jnp.float32) + b

    for i in range(hidden_depth):
        y = jnp.tanh(linear(y, i))                              # hidden layer + tanh
        # dropout(0.25) is identity at inference.

    z_out = linear(y, hidden_depth)                             # output layer (no activation)

    # Residual add: z0's columns [0, n_dep) hold single_layer(x); z_out's columns
    # beyond n_dep are zero and everything past n_dep is sliced off in the wrapper,
    # so a plain full-width add is correct and keeps the store lane-dense.
    out_ref[...] = (z_out + z0).astype(out_ref.dtype)


def pack_params(weights, biases, n_independent, n_dependent, n_hidden, hidden_depth):
    """One-time numpy packing of all layer params (no per-call .at[].set() chains).

    Layer order in `weights`/`biases`: input, hidden_0..hidden_{D-1}, output, single.
    Returns (wx, bx, w_blob, b_blob).
    """
    assert len(weights) == hidden_depth + 3
    P = _round_up(n_hidden + n_dependent, 128)          # lane-dense feature width
    n_ind_pad = _round_up(max(n_independent, 8), 8)     # narrow x slab, not 128-padded

    # Fused x slab (f32, small K): skip at cols [0, n_dep), input at cols [n_dep, n_dep+n_hidden)
    wx = np.zeros((n_ind_pad, P), np.float32)
    bx = np.zeros((1, P), np.float32)
    w_in = np.asarray(weights[0], np.float32)
    b_in = np.asarray(biases[0], np.float32)
    w_sk = np.asarray(weights[hidden_depth + 2], np.float32)
    b_sk = np.asarray(biases[hidden_depth + 2], np.float32)
    wx[:n_independent, :n_dependent] = w_sk
    bx[0, :n_dependent] = b_sk
    wx[:n_independent, n_dependent:n_dependent + n_hidden] = w_in
    bx[0, n_dependent:n_dependent + n_hidden] = b_in

    # Square blob: hidden layers 0..D-1 then the output layer.  The first slab's
    # rows are offset by n_dep because the input activation lives at columns
    # [n_dep, n_dep+n_hidden) of the fused layer's output.
    n_layers = hidden_depth + 1
    w_blob = np.zeros((n_layers, P, P), np.float32)
    b_blob = np.zeros((n_layers, 1, P), np.float32)
    for li in range(n_layers):
        w = np.asarray(weights[1 + li], np.float32)
        b = np.asarray(biases[1 + li], np.float32)
        fin, fout = w.shape
        roff = n_dependent if li == 0 else 0
        w_blob[li, roff:roff + fin, :fout] = w
        b_blob[li, 0, :fout] = b

    return (jnp.asarray(wx), jnp.asarray(bx),
            jnp.asarray(w_blob, dtype=jnp.bfloat16), jnp.asarray(b_blob))


def densenet_forward(x, packed, hidden_depth, n_dependent, *, tb=128):
    """Run the fused DenseNet forward. `packed` comes from pack_params()."""
    wx, bx, w_blob, b_blob = packed
    n_ind_pad, P = wx.shape
    B, n_ind = x.shape

    # Pad batch to a multiple of the tile; keep x narrow (n_ind_pad lanes, not 128).
    B_pad = _round_up(B, tb)
    x_pad = jnp.pad(x.astype(jnp.float32),
                    ((0, B_pad - B), (0, n_ind_pad - n_ind)))

    kernel = functools.partial(_densenet_kernel, hidden_depth=hidden_depth)

    # VMEM budget: resident blobs are (hidden_depth+1)*P*P*2 bytes (bf16) plus
    # double-buffered (tb, n_ind_pad) / (tb, P) tiles -- a few hundred KiB here.
    # v7x guard: if P or tb grow, keep total under ~24 MiB or pipeline over layers.
    out_pad = pl.pallas_call(
        kernel,
        out_shape=jax.ShapeDtypeStruct((B_pad, P), jnp.float32),
        grid_spec=pltpu.PrefetchScalarGridSpec(
            num_scalar_prefetch=0,
            grid=(B_pad // tb,),
            in_specs=[
                pl.BlockSpec((tb, n_ind_pad), lambda i: (i, 0)),     # x tile (pipelined)
                pl.BlockSpec((n_ind_pad, P), lambda i: (0, 0)),      # fused x weights, resident
                pl.BlockSpec((1, P), lambda i: (0, 0)),              # fused x biases, resident
                pl.BlockSpec((hidden_depth + 1, P, P), lambda i: (0, 0, 0)),   # hidden/out weights
                pl.BlockSpec((hidden_depth + 1, 1, P), lambda i: (0, 0, 0)),   # hidden/out biases
                # NOTE: pipeline_mode=pl.Buffered(1) on the resident blobs would drop their
                # (unused) second buffer; immaterial at this size, so left at the default.
            ],
            out_specs=pl.BlockSpec((tb, P), lambda i: (i, 0)),
        ),
        compiler_params=pltpu.CompilerParams(
            dimension_semantics=("parallel",),     # v7x: batch grid sharded over 2 TCs
            vmem_limit_bytes=32 * 1024 * 1024,
        ),
    )(x_pad, wx, bx, w_blob, b_blob)

    return out_pad[:B, :n_dependent].astype(x.dtype)


def build_layer_dims(n_independent, n_dependent, n_hidden, hidden_depth):
    """Replicates DenseNet.__init__'s layer list (plus the single_layer skip)."""
    dims = [(n_independent, n_hidden)]                     # input_layer
    dims += [(n_hidden, n_hidden)] * hidden_depth          # hidden_layers
    dims += [(n_hidden, n_dependent)]                      # output_layer
    dims += [(n_independent, n_dependent)]                 # single_layer (skip)
    return dims


def init_params(key, dims):
    """Deterministic nn.Linear-style uniform init in [-1/sqrt(fin), 1/sqrt(fin)]."""
    weights, biases = [], []
    for fin, fout in dims:
        key, kw, kb = jax.random.split(key, 3)
        bound = 1.0 / (fin ** 0.5)
        weights.append(jax.random.uniform(kw, (fin, fout), jnp.float32, -bound, bound))
        biases.append(jax.random.uniform(kb, (fout,), jnp.float32, -bound, bound))
    return weights, biases


def reference_forward(x, weights, biases, hidden_depth):
    """Pure-JAX reference with the same numerics as the kernel:
    f32 matmuls for the x-consuming layers, bf16-in/f32-acc for hidden/output."""
    def lin_bf16(v, w, b):
        return jnp.dot(v.astype(jnp.bfloat16), w.astype(jnp.bfloat16),
                       preferred_element_type=jnp.float32) + b
    x32 = x.astype(jnp.float32)
    y = jnp.tanh(jnp.dot(x32, weights[0], preferred_element_type=jnp.float32) + biases[0])
    for i in range(hidden_depth):
        y = jnp.tanh(lin_bf16(y, weights[1 + i], biases[1 + i]))
    out = lin_bf16(y, weights[hidden_depth + 1], biases[hidden_depth + 1])
    skip = jnp.dot(x32, weights[hidden_depth + 2],
                   preferred_element_type=jnp.float32) + biases[hidden_depth + 2]
    return out + skip


if __name__ == "__main__":
    batch = 512            # tb=128 -> grid=4 (even: 2 steps per TC on v7x, pipelined on v5e/v6e)
    n_independent = 4
    n_dependent = 4
    n_hidden = 32
    hidden_depth = 4

    key = jax.random.PRNGKey(0)
    key, kx = jax.random.split(key)
    x = jax.random.normal(kx, (batch, n_independent), dtype=jnp.float32)

    dims = build_layer_dims(n_independent, n_dependent, n_hidden, hidden_depth)
    weights, biases = init_params(key, dims)

    # Pack weights/biases once (outside the hot path).
    packed = pack_params(weights, biases, n_independent, n_dependent,
                         n_hidden, hidden_depth)

    out = densenet_forward(x, packed, hidden_depth, n_dependent, tb=128)
    out = jax.block_until_ready(out)

    ref = reference_forward(x, weights, biases, hidden_depth)
    assert out.shape == (batch, n_dependent)
    assert jnp.allclose(out, ref, atol=1e-2, rtol=1e-2), "mismatch vs reference"

    print("KERNEL_OK")
</pallas_src>

<mosaic_0001>
module attributes {stable_mosaic.version = 11 : i64} {
  func.func @_densenet_kernel(%arg0: i32, %arg1: memref<128x8xf32, #tpu.memory_space<vmem>>, %arg2: memref<8x128xf32, #tpu.memory_space<vmem>>, %arg3: memref<1x128xf32, #tpu.memory_space<vmem>>, %arg4: memref<5x128x128xbf16, #tpu.memory_space<vmem>>, %arg5: memref<5x1x128xf32, #tpu.memory_space<vmem>>, %arg6: memref<128x128xf32, #tpu.memory_space<vmem>>) attributes {dimension_semantics = [#tpu.dimension_semantics<parallel>], iteration_bounds = array<i64: 4>, scalar_prefetch = 0 : i64, scratch_operands = 0 : i64, tpu.core_type = #tpu.core_type<tc>, window_params = [{transform_indices = @transform_0, window_bounds = array<i64: 128, 8>}, {pipeline_mode = #tpu.pipeline_mode<synchronous>, transform_indices = @transform_1, window_bounds = array<i64: 8, 128>}, {pipeline_mode = #tpu.pipeline_mode<synchronous>, transform_indices = @transform_2, window_bounds = array<i64: 1, 128>}, {pipeline_mode = #tpu.pipeline_mode<synchronous>, transform_indices = @transform_3, window_bounds = array<i64: 5, 128, 128>}, {pipeline_mode = #tpu.pipeline_mode<synchronous>, transform_indices = @transform_4, window_bounds = array<i64: 5, 1, 128>}, {transform_indices = @transform_5, window_bounds = array<i64: 128, 128>}]} {
    %c0 = arith.constant 0 : index
    %c0_0 = arith.constant 0 : index
    %0 = vector.load %arg1[%c0, %c0_0] : memref<128x8xf32, #tpu.memory_space<vmem>>, vector<128x8xf32>
    %c0_1 = arith.constant 0 : index
    %c0_2 = arith.constant 0 : index
    %1 = vector.load %arg2[%c0_1, %c0_2] : memref<8x128xf32, #tpu.memory_space<vmem>>, vector<8x128xf32>
    %cst = arith.constant dense<0.000000e+00> : vector<128x128xf32>
    %2 = tpu.matmul %0, %1, %cst {dimension_numbers = #tpu.dot_dimension_numbers<[1], [0], [0], [1], [0, 0, 1, 1], [], []>} : vector<128x8xf32>, vector<8x128xf32>, vector<128x128xf32> -> vector<128x128xf32>
    %c0_3 = arith.constant 0 : index
    %c0_4 = arith.constant 0 : index
    %3 = vector.load %arg3[%c0_3, %c0_4] : memref<1x128xf32, #tpu.memory_space<vmem>>, vector<1x128xf32>
    %4 = vector.broadcast %3 : vector<1x128xf32> to vector<128x128xf32>
    %5 = arith.addf %2, %4 : vector<128x128xf32>
    %6 = math.tanh %5 : vector<128x128xf32>
    %c0_5 = arith.constant 0 : index
    %c0_6 = arith.constant 0 : index
    %c0_7 = arith.constant 0 : index
    %7 = vector.load %arg4[%c0_5, %c0_6, %c0_7] : memref<5x128x128xbf16, #tpu.memory_space<vmem>>, vector<1x128x128xbf16>
    %8 = vector.shape_cast %7 : vector<1x128x128xbf16> to vector<128x128xbf16>
    %c0_8 = arith.constant 0 : index
    %c0_9 = arith.constant 0 : index
    %c0_10 = arith.constant 0 : index
    %9 = vector.load %arg5[%c0_8, %c0_9, %c0_10] : memref<5x1x128xf32, #tpu.memory_space<vmem>>, vector<1x1x128xf32>
    %10 = vector.shape_cast %9 : vector<1x1x128xf32> to vector<1x128xf32>
    %11 = arith.truncf %6 : vector<128x128xf32> to vector<128x128xbf16>
    %cst_11 = arith.constant dense<0.000000e+00> : vector<128x128xf32>
    %12 = tpu.matmul %11, %8, %cst_11 {dimension_numbers = #tpu.dot_dimension_numbers<[1], [0], [0], [1], [0, 0, 1, 1], [], []>} : vector<128x128xbf16>, vector<128x128xbf16>, vector<128x128xf32> -> vector<128x128xf32>
    %13 = vector.broadcast %10 : vector<1x128xf32> to vector<128x128xf32>
    %14 = arith.addf %12, %13 : vector<128x128xf32>
    %15 = math.tanh %14 : vector<128x128xf32>
    %c1 = arith.constant 1 : index
    %c0_12 = arith.constant 0 : index
    %c0_13 = arith.constant 0 : index
    %16 = vector.load %arg4[%c1, %c0_12, %c0_13] : memref<5x128x128xbf16, #tpu.memory_space<vmem>>, vector<1x128x128xbf16>
    %17 = vector.shape_cast %16 : vector<1x128x128xbf16> to vector<128x128xbf16>
    %c1_14 = arith.constant 1 : index
    %c0_15 = arith.constant 0 : index
    %c0_16 = arith.constant 0 : index
    %18 = vector.load %arg5[%c1_14, %c0_15, %c0_16] : memref<5x1x128xf32, #tpu.memory_space<vmem>>, vector<1x1x128xf32>
    %19 = vector.shape_cast %18 : vector<1x1x128xf32> to vector<1x128xf32>
    %20 = arith.truncf %15 : vector<128x128xf32> to vector<128x128xbf16>
    %cst_17 = arith.constant dense<0.000000e+00> : vector<128x128xf32>
    %21 = tpu.matmul %20, %17, %cst_17 {dimension_numbers = #tpu.dot_dimension_numbers<[1], [0], [0], [1], [0, 0, 1, 1], [], []>} : vector<128x128xbf16>, vector<128x128xbf16>, vector<128x128xf32> -> vector<128x128xf32>
    %22 = vector.broadcast %19 : vector<1x128xf32> to vector<128x128xf32>
    %23 = arith.addf %21, %22 : vector<128x128xf32>
    %24 = math.tanh %23 : vector<128x128xf32>
    %c2 = arith.constant 2 : index
    %c0_18 = arith.constant 0 : index
    %c0_19 = arith.constant 0 : index
    %25 = vector.load %arg4[%c2, %c0_18, %c0_19] : memref<5x128x128xbf16, #tpu.memory_space<vmem>>, vector<1x128x128xbf16>
    %26 = vector.shape_cast %25 : vector<1x128x128xbf16> to vector<128x128xbf16>
    %c2_20 = arith.constant 2 : index
    %c0_21 = arith.constant 0 : index
    %c0_22 = arith.constant 0 : index
    %27 = vector.load %arg5[%c2_20, %c0_21, %c0_22] : memref<5x1x128xf32, #tpu.memory_space<vmem>>, vector<1x1x128xf32>
    %28 = vector.shape_cast %27 : vector<1x1x128xf32> to vector<1x128xf32>
    %29 = arith.truncf %24 : vector<128x128xf32> to vector<128x128xbf16>
    %cst_23 = arith.constant dense<0.000000e+00> : vector<128x128xf32>
    %30 = tpu.matmul %29, %26, %cst_23 {dimension_numbers = #tpu.dot_dimension_numbers<[1], [0], [0], [1], [0, 0, 1, 1], [], []>} : vector<128x128xbf16>, vector<128x128xbf16>, vector<128x128xf32> -> vector<128x128xf32>
    %31 = vector.broadcast %28 : vector<1x128xf32> to vector<128x128xf32>
    %32 = arith.addf %30, %31 : vector<128x128xf32>
    %33 = math.tanh %32 : vector<128x128xf32>
    %c3 = arith.constant 3 : index
    %c0_24 = arith.constant 0 : index
    %c0_25 = arith.constant 0 : index
    %34 = vector.load %arg4[%c3, %c0_24, %c0_25] : memref<5x128x128xbf16, #tpu.memory_space<vmem>>, vector<1x128x128xbf16>
    %35 = vector.shape_cast %34 : vector<1x128x128xbf16> to vector<128x128xbf16>
    %c3_26 = arith.constant 3 : index
    %c0_27 = arith.constant 0 : index
    %c0_28 = arith.constant 0 : index
    %36 = vector.load %arg5[%c3_26, %c0_27, %c0_28] : memref<5x1x128xf32, #tpu.memory_space<vmem>>, vector<1x1x128xf32>
    %37 = vector.shape_cast %36 : vector<1x1x128xf32> to vector<1x128xf32>
    %38 = arith.truncf %33 : vector<128x128xf32> to vector<128x128xbf16>
    %cst_29 = arith.constant dense<0.000000e+00> : vector<128x128xf32>
    %39 = tpu.matmul %38, %35, %cst_29 {dimension_numbers = #tpu.dot_dimension_numbers<[1], [0], [0], [1], [0, 0, 1, 1], [], []>} : vector<128x128xbf16>, vector<128x128xbf16>, vector<128x128xf32> -> vector<128x128xf32>
    %40 = vector.broadcast %37 : vector<1x128xf32> to vector<128x128xf32>
    %41 = arith.addf %39, %40 : vector<128x128xf32>
    %42 = math.tanh %41 : vector<128x128xf32>
    %c4 = arith.constant 4 : index
    %c0_30 = arith.constant 0 : index
    %c0_31 = arith.constant 0 : index
    %43 = vector.load %arg4[%c4, %c0_30, %c0_31] : memref<5x128x128xbf16, #tpu.memory_space<vmem>>, vector<1x128x128xbf16>
    %44 = vector.shape_cast %43 : vector<1x128x128xbf16> to vector<128x128xbf16>
    %c4_32 = arith.constant 4 : index
    %c0_33 = arith.constant 0 : index
    %c0_34 = arith.constant 0 : index
    %45 = vector.load %arg5[%c4_32, %c0_33, %c0_34] : memref<5x1x128xf32, #tpu.memory_space<vmem>>, vector<1x1x128xf32>
    %46 = vector.shape_cast %45 : vector<1x1x128xf32> to vector<1x128xf32>
    %47 = arith.truncf %42 : vector<128x128xf32> to vector<128x128xbf16>
    %cst_35 = arith.constant dense<0.000000e+00> : vector<128x128xf32>
    %48 = tpu.matmul %47, %44, %cst_35 {dimension_numbers = #tpu.dot_dimension_numbers<[1], [0], [0], [1], [0, 0, 1, 1], [], []>} : vector<128x128xbf16>, vector<128x128xbf16>, vector<128x128xf32> -> vector<128x128xf32>
    %49 = vector.broadcast %46 : vector<1x128xf32> to vector<128x128xf32>
    %50 = arith.addf %48, %49 : vector<128x128xf32>
    %51 = arith.addf %50, %5 : vector<128x128xf32>
    %c0_36 = arith.constant 0 : index
    %c0_37 = arith.constant 0 : index
    %52 = vector.load %arg6[%c0_36, %c0_37] : memref<128x128xf32, #tpu.memory_space<vmem>>, vector<128x128xf32>
    tpu.vector_store %arg6[%c0_36, %c0_37], %51 {strides = array<i32>} : memref<128x128xf32, #tpu.memory_space<vmem>>, vector<128x128xf32>,
    return
  }
  func.func @transform_0(%arg0: i32) -> (i32, i32) {
    %c0_i32 = arith.constant 0 : i32
    %c0_i32_0 = arith.constant 0 : i32
    return %arg0, %c0_i32 : i32, i32
  }
  func.func @transform_1(%arg0: i32) -> (i32, i32) {
    %c0_i32 = arith.constant 0 : i32
    %c0_i32_0 = arith.constant 0 : i32
    %c0_i32_1 = arith.constant 0 : i32
    return %c0_i32, %c0_i32_0 : i32, i32
  }
  func.func @transform_2(%arg0: i32) -> (i32, i32) {
    %c0_i32 = arith.constant 0 : i32
    %c0_i32_0 = arith.constant 0 : i32
    %c0_i32_1 = arith.constant 0 : i32
    return %c0_i32, %c0_i32_0 : i32, i32
  }
  func.func @transform_3(%arg0: i32) -> (i32, i32, i32) {
    %c0_i32 = arith.constant 0 : i32
    %c0_i32_0 = arith.constant 0 : i32
    %c0_i32_1 = arith.constant 0 : i32
    %c0_i32_2 = arith.constant 0 : i32
    return %c0_i32, %c0_i32_0, %c0_i32_1 : i32, i32, i32
  }
  func.func @transform_4(%arg0: i32) -> (i32, i32, i32) {
    %c0_i32 = arith.constant 0 : i32
    %c0_i32_0 = arith.constant 0 : i32
    %c0_i32_1 = arith.constant 0 : i32
    %c0_i32_2 = arith.constant 0 : i32
    return %c0_i32, %c0_i32_0, %c0_i32_1 : i32, i32, i32
  }
  func.func @transform_5(%arg0: i32) -> (i32, i32) {
    %c0_i32 = arith.constant 0 : i32
    %c0_i32_0 = arith.constant 0 : i32
    return %arg0, %c0_i32 : i32, i32
  }
}

</mosaic_0001>

<bundles_post_ra>
// kernel: tpu_custom_call.1
= control target key start
LH: loop header
LB: loop body
LE: loop exit
PB: predicated region body
PF: predicated region fallthrough
CT: control target
= control target key end

     0   :  { %10 = vsyncpa [#allocation3], 0  ;;  %s2713_s0 = inlined_call_operand.vmem [shape: f32[512,8], index: 0, kind: input, shape index: {}]   ;;  %s2714_s1 = inlined_call_operand.vmem [shape: f32[8,128], index: 1, kind: input, shape index: {}]   ;;  %s2715_s2 = inlined_call_operand.vmem [shape: f32[1,128], index: 2, kind: input, shape index: {}]   ;;  %s2716_s3 = inlined_call_operand.vmem [shape: bf16[5,128,128], index: 3, kind: input, shape index: {}]   ;;  %s2717_s4 = inlined_call_operand.vmem [shape: f32[5,1,128], index: 4, kind: input, shape index: {}]   ;;  %s2718_s5 = inlined_call_operand.hbm [shape: f32[512,128], index: 5, kind: output, shape index: {}]  }
   0x1   :  { %12 = vsyncpa [#allocation3 + $0x1], 0  ;;  %s2301_s18 = smov 0   ;;  %s2303_s19 = smov 0  }
   0x2   :  { %s2305_s20 = smov 0   ;;  %s2307_s21 = smov 0  }
   0x3 LB: > { %s2322_s22 = sadd.s32 4294967295, %s2266_s21   ;;  %s1521_s23 = sadd.s32 4294967294, %s2266_s21   ;;  %s2266_s21 = sphi %s2307_s21, %s2724_s21   ;;  %s2262_s20 = sphi %s2305_s20, %s2723_s20   ;;  %s2258_s19 = sphi %s2303_s19, %s2722_s19   ;;  %s2254_s18 = sphi %s2301_s18, %s2721_s18  }
   0x4   : > { %s2326_s24 = sadd.s32 1, %s2266_s21   ;;  %s135_s25 = sadd.s32 1, %s2262_s20 }
   0x5   : > { %s132_s26 = ssub.s32 %s2266_s21, %s2326_s24  ;;  %p145_p0 = scmp.ne.s32.totalorder %s2262_s20, %s2258_s19 }
   0x6   : > { %p133_p1 = scmp.eq.s32.totalorder %s132_s26, 0  ;;  %p146_p2 = scmp.eq.s32.totalorder %s2322_s22, 3 }
   0x7   : > { %p151_p3 = scmp.ne.s32.totalorder %s2258_s19, %s2254_s18  ;;  %p152_p4 = scmp.eq.s32.totalorder %s1521_s23, 3 }
   0x8   : > { %s2337_s27 = scalar_select %p133_p1, %s2262_s20, %s135_s25  }
   0x9   : > { %p2339_p5 = por %p146_p2, %p145_p0  ;;  %p2343_p6 = por %p152_p4, %p151_p3 }
   0xa   : > { %p1524_p7 = scmp.ge.s32.totalorder %s2266_s21, 1  ;;  %p191_p8 = scmp.lt.s32.totalorder %s2266_s21, 5 }
   0xc   : > { %p192_p9 = pnand %p1524_p7, %p191_p8 }
   0xd   : > { %v243_v0 = vld [vmem:[%s2714_s1] sm:$0xff] (!%p192_p9)  ;;  %s1526_s7 = sshll.u32 (!%p192_p9), %s2322_s22, 4  ;;  %v2005_v2 = vld [vmem:[%s2716_s3 + $0x8] sm:$0xff] (!%p192_p9)   ;;  %v2006_v3 = vld [vmem:[%s2716_s3 + $0x10] sm:$0xff] (!%p192_p9)   ;;  %vm251_vm0 = vcmask (!%p192_p9), 64512   ;;  %s216_s6 = sand.u32 (!%p192_p9), 1, %s2258_s19  }
   0xe   : > { %195 = sbr.rel (%p192_p9) target bundleno = 1440 (0x5a0), region = 40  ;;  %v2004_v1 = vld [vmem:[%s2716_s3] sm:$0xff] (!%p192_p9)   ;;  %1761 = vmatprep.subr.mxu0 (!%p192_p9), %v243_v0  ;;  %p220_p10 = scmp.lt.s32.totalorder (!%p192_p9), %s1526_s7, 63  ;;  %v2007_v20 = vld [vmem:[%s2716_s3 + $0x18] sm:$0xff] (!%p192_p9)   ;;  %v2009_v22 = vld [vmem:[%s2716_s3 + $0x28] sm:$0xff] (!%p192_p9)  }
   0xf   : > { %1762 = vmatpush3.msra.mxu0 (!%p192_p9), %v243_v0  ;;  %1787 = vmatprep.subr.bf16.mxu1 (!%p192_p9), %v2004_v1  ;;  %v2008_v21 = vld [vmem:[%s2716_s3 + $0x20] sm:$0xff] (!%p192_p9)   ;;  %v2010_v23 = vld [vmem:[%s2716_s3 + $0x30] sm:$0xff] (!%p192_p9)   ;;  %v2011_v24 = vld [vmem:[%s2716_s3 + $0x38] sm:$0xff] (!%p192_p9)   ;;  %s1525_s9 = sshll.u32 (!%p192_p9), %s216_s6, 7  ;;  %s1663_s11 = sshll.u32 (!%p192_p9), %s2322_s22, 11 }
  0x10   : > { %1788 = vmatpush3.bf16.msra.mxu1 (!%p192_p9), %v2004_v1  ;;  %v2012_v25 = vld [vmem:[%s2716_s3 + $0x40] sm:$0xff] (!%p192_p9)   ;;  %v2013_v26 = vld [vmem:[%s2716_s3 + $0x48] sm:$0xff] (!%p192_p9)   ;;  %v2014_v27 = vld [vmem:[%s2716_s3 + $0x50] sm:$0xff] (!%p192_p9)   ;;  %s2629_s10 = scalar_lea.vmem (!%p192_p9), [#allocation2], %s1525_s9  ;;  %s2662_s15 = scalar_lea.hbm (!%p192_p9), %s2718_s5, %s1663_s11 }
  0x11   : > { %1789 = vmatprep.subr.bf16.mxu1 (!%p192_p9), %v2005_v2  ;;  %1819 = vmatprep.subr.bf16.mxu0 (!%p192_p9), %v2012_v25  ;;  %v2015_v28 = vld [vmem:[%s2716_s3 + $0x58] sm:$0xff] (!%p192_p9)   ;;  %v2429_v29 = vld [vmem:[%s2715_s2] ss:$0 sm:$0xff] (!%p192_p9)  ;;  %s1459_s12 = sshll.u32 (!%p192_p9), %s2629_s10, 4  ;;  %s2672_s22 = scalar_lea.sflag (!%p192_p9), [#allocation3], %s216_s6  ;;  %s2664_s12 = int_to_ptr.vmem [resolvable:$true] %s1459_s12 }
  0x12   : > { %s2204_s16 = scalar_lea.vmem (!%p192_p9), %s2664_s12, 2048 }
  0x13   : > { %p2205_p11 = scmp.ne.s32.totalorder (!%p192_p9), %s2664_s12, %s2204_s16 }
  0x14   : > { %1790 = vmatpush3.bf16.msra.mxu1 (!%p192_p9), %v2005_v2 }
  0x15   : > { %s2726_s7 = smov (!%p220_p10, %s1526_s7), 63  ;;  %1791 = vmatprep.subr.bf16.mxu1 %v2006_v3  ;;  %p2206_p12 = pnand %p2205_p11, %p2339_p5 }
  0x16   : > { %s1527_s14 = sshll.u32 %s2726_s7, 3 }
  0x17   : > { %s2365_s17 = scalar_lea.vmem %s2713_s0, %s1527_s14  ;;  %p2207_p13 = pneg %p2206_p12 }
  0x18   : > { %v227_v4 = vld [vmem:[%s2365_s17] sm:$0xff]  ;;  %v228_v5 = vld [vmem:[%s2365_s17 + $0x8] sm:$0xff]  ;;  %v229_v6 = vld [vmem:[%s2365_s17 + $0x10] sm:$0xff]  ;;  %1792 = vmatpush3.bf16.msra.mxu1 %v2006_v3 }
  0x19   : > { %1763 = vmatprep.mubr.msk.f32.mxu0 %vm251_vm0, %v227_v4  ;;  %v230_v7 = vld [vmem:[%s2365_s17 + $0x18] sm:$0xff]  ;;  %v231_v8 = vld [vmem:[%s2365_s17 + $0x20] sm:$0xff]  ;;  %v232_v9 = vld [vmem:[%s2365_s17 + $0x28] sm:$0xff]  ;;  %1793 = vmatprep.subr.bf16.mxu1 %v2007_v20 }
  0x1a   : > { %1764 = vmatmul.mubr.msk.f32.vlgmr.msra.gmra.mrb[0].mxu0 %vm251_vm0, %v228_v5  ;;  %v233_v10 = vld [vmem:[%s2365_s17 + $0x30] sm:$0xff]  ;;  %v234_v11 = vld [vmem:[%s2365_s17 + $0x38] sm:$0xff]  ;;  %v235_v12 = vld [vmem:[%s2365_s17 + $0x40] sm:$0xff] }
  0x1b   : > { %1766 = vmatprep.mubr.msk.f32.mxu0 %vm251_vm0, %v229_v6  ;;  %v236_v13 = vld [vmem:[%s2365_s17 + $0x48] sm:$0xff]  ;;  %v237_v14 = vld [vmem:[%s2365_s17 + $0x50] sm:$0xff]  ;;  %v238_v15 = vld [vmem:[%s2365_s17 + $0x58] sm:$0xff]  ;;  %1820 = vmatpush3.bf16.msra.mxu0 %v2012_v25 }
  0x1c   : > { %v239_v16 = vld [vmem:[%s2365_s17 + $0x60] sm:$0xff]  ;;  %v240_v17 = vld [vmem:[%s2365_s17 + $0x68] sm:$0xff]  ;;  %v241_v18 = vld [vmem:[%s2365_s17 + $0x70] sm:$0xff]  ;;  %1794 = vmatpush3.bf16.msra.mxu1 %v2007_v20  ;;  %1821 = vmatprep.subr.bf16.mxu0 %v2013_v26 }
  0x1d   : > { %v242_v19 = vld [vmem:[%s2365_s17 + $0x78] sm:$0xff]  ;;  %1795 = vmatprep.subr.bf16.mxu1 %v2008_v21  ;;  %s2268_s17 = smov [#allocation2]  }
  0x1e   : > { %1767 = vmatmul.mubr.msk.f32.gmra.mrb[2].mxu0 %vm251_vm0, %v230_v7  ;;  %v2019_v25 = vld [vmem:[%s2716_s3 + $0x78] sm:$0xff]   ;;  %s2208_s23 = sshll.u32 %s2268_s17, 4  ;;  %s2209_s23 = int_to_ptr.vmem [resolvable:$false] %s2208_s23 }
  0x1f   : > { %1769 = vmatprep.mubr.msk.f32.mxu0 %vm251_vm0, %v231_v8  ;;  %1822 = vmatpush3.bf16.msra.mxu0 %v2013_v26  ;;  %v2020_v26 = vld [vmem:[%s2716_s3 + $0x80] sm:$0xff]   ;;  %s2210_s25 = scalar_lea.vmem %s2209_s23, 4096  ;;  %p2211_p0 = scmp.lt.s32.totalorder %s2664_s12, %s2209_s23 }
  0x20   : > { %1796 = vmatpush3.bf16.msra.mxu1 %v2008_v21  ;;  %1823 = vmatprep.subr.bf16.mxu0 %v2014_v27  ;;  %p2212_p1 = scmp.lt.s32.totalorder %s2210_s25, %s2204_s16 }
  0x21   : > { %1797 = vmatprep.subr.bf16.mxu1 %v2009_v22 }
  0x22   : > { %1770 = vmatmul.mubr.msk.f32.gmra.mrb[4].mxu0 %vm251_vm0, %v232_v9  ;;  %p2213_p2 = por %p2212_p1, %p2211_p0 }
  0x23   : > { %1772 = vmatprep.mubr.msk.f32.mxu0 %vm251_vm0, %v233_v10  ;;  %1824 = vmatpush3.bf16.msra.mxu0 %v2014_v27  ;;  %v2021_v27 = vld [vmem:[%s2716_s3 + $0x88] sm:$0xff]  }
  0x24   : > { %1798 = vmatpush3.bf16.msra.mxu1 %v2009_v22  ;;  %1825 = vmatprep.subr.bf16.mxu0 %v2015_v28  ;;  %v2016_v22 = vld [vmem:[%s2716_s3 + $0x60] sm:$0xff]   ;;  %p2214_p3 = pnand %p2213_p2, %p2207_p13 }
  0x25   : > { %1799 = vmatprep.subr.bf16.mxu1 %v2010_v23 }
  0x26   : > { %1773 = vmatmul.mubr.msk.f32.gmra.mrb[6].mxu0 %vm251_vm0, %v234_v11 }
  0x27   : > { %1775 = vmatprep.mubr.msk.f32.mxu0 %vm251_vm0, %v235_v12  ;;  %1826 = vmatpush3.bf16.msra.mxu0 %v2015_v28  ;;  %v2022_v28 = vld [vmem:[%s2716_s3 + $0x90] sm:$0xff]  }
  0x28   : > { %1800 = vmatpush3.bf16.msra.mxu1 %v2010_v23  ;;  %1827 = vmatprep.subr.bf16.mxu0 %v2016_v22  ;;  %v2017_v23 = vld [vmem:[%s2716_s3 + $0x68] sm:$0xff]  }
  0x29   : > { %1801 = vmatprep.subr.bf16.mxu1 %v2011_v24 }
  0x2a   : > { %1776 = vmatmul.mubr.msk.f32.gmra.mrb[8].mxu0 %vm251_vm0, %v236_v13 }
  0x2b   : > { %1778 = vmatprep.mubr.msk.f32.mxu0 %vm251_vm0, %v237_v14  ;;  %1828 = vmatpush3.bf16.msra.mxu0 %v2016_v22 }
  0x2c   : > { %1802 = vmatpush3.bf16.msra.mxu1 %v2011_v24  ;;  %1829 = vmatprep.subr.bf16.mxu0 %v2017_v23  ;;  %v2018_v24 = vld [vmem:[%s2716_s3 + $0x70] sm:$0xff]  }
  0x2d   : > { %1851 = vmatprep.subr.bf16.mxu1 %v2020_v26 }
  0x2e   : > { %1779 = vmatmul.mubr.msk.f32.gmra.mrb[10].mxu0 %vm251_vm0, %v238_v15 }
  0x2f   : > { %1781 = vmatprep.mubr.msk.f32.mxu0 %vm251_vm0, %v239_v16  ;;  %1830 = vmatpush3.bf16.msra.mxu0 %v2017_v23 }
  0x30   : > { %1831 = vmatprep.subr.bf16.mxu0 %v2018_v24 }
  0x32   : > { %1782 = vmatmul.mubr.msk.f32.gmra.mrb[12].mxu0 %vm251_vm0, %v240_v17 }
  0x33   : > { %1784 = vmatprep.mubr.msk.f32.mxu0 %vm251_vm0, %v241_v18  ;;  %1832 = vmatpush3.bf16.msra.mxu0 %v2018_v24 }
  0x34   : > { %1833 = vmatprep.subr.bf16.mxu0 %v2019_v25 }
  0x36   : > { %1785 = vmatmul.mubr.msk.f32.gmra.mrb[14].mxu0 %vm251_vm0, %v242_v19 }
  0x37   : > { %1834 = vmatpush3.bf16.msra.mxu0 %v2019_v25 }
  0xed   : > { %v1765_v30 = vpop.f32.mrb[0].mxu0 }
  0xee   : > { %v2432_v31 = vadd.f32 %v1765_v30, %v2429_v29  ;;  %v366_v32 = vpop.f32.mrb[1].mxu0  ;;  %v1545_v30 = vld [vmem:[%s2717_s4] ss:$0 sm:$0xff] }
  0xef   : > { %v2435_v33 = vadd.f32 %v2429_v29, %v366_v32 }
  0xf0   : > { %2044 = vtanh.f32 %v2432_v31 }
  0xf1   : > { %2046 = vtanh.f32 %v2435_v33  ;;  %v1768_v34 = vpop.f32.mrb[2].mxu0 }
  0xf2   : > { %v2440_v35 = vadd.f32 %v1768_v34, %v2429_v29  ;;  %v376_v36 = vpop.f32.mrb[3].mxu0 }
  0xf3   : > { %v2443_v37 = vadd.f32 %v2429_v29, %v376_v36 }
  0xf4   : > { %2048 = vtanh.f32 %v2440_v35 }
  0xf5   : > { %2050 = vtanh.f32 %v2443_v37  ;;  %v1771_v38 = vpop.f32.mrb[4].mxu0 }
  0xf6   : > { %v2448_v39 = vadd.f32 %v1771_v38, %v2429_v29  ;;  %v386_v40 = vpop.f32.mrb[5].mxu0 }
  0xf7   : > { %v2451_v41 = vadd.f32 %v2429_v29, %v386_v40 }
  0xf8   : > { %2052 = vtanh.f32 %v2448_v39 }
  0xf9   : > { %2054 = vtanh.f32 %v2451_v41  ;;  %v1774_v42 = vpop.f32.mrb[6].mxu0 }
  0xfa   : > { %v2045_v43 = vpop.eup %2044  ;;  %v2456_v44 = vadd.f32 %v1774_v42, %v2429_v29  ;;  %v396_v45 = vpop.f32.mrb[7].mxu0 }
  0xfb   : > { %v2047_v46 = vpop.eup %2046  ;;  %v2459_v47 = vadd.f32 %v2429_v29, %v396_v45 }
  0xfc   : > { %2056 = vtanh.f32 %v2456_v44  ;;  %v478_v48 = vpack.c.bf16 %v2045_v43, %v2047_v46 }
  0xfd   : > { %2058 = vtanh.f32 %v2459_v47  ;;  %v1777_v49 = vpop.f32.mrb[8].mxu0 }
  0xfe   : > { %v2049_v50 = vpop.eup %2048  ;;  %v2464_v51 = vadd.f32 %v1777_v49, %v2429_v29  ;;  %v406_v52 = vpop.f32.mrb[9].mxu0  ;;  %1803 = vmatprep.mubr.bf16.mxu1 %v478_v48 }
  0xff   : > { %v2051_v53 = vpop.eup %2050  ;;  %v2467_v54 = vadd.f32 %v2429_v29, %v406_v52 }
 0x100   : > { %2060 = vtanh.f32 %v2464_v51  ;;  %v479_v55 = vpack.c.bf16 %v2049_v50, %v2051_v53 }
 0x101   : > { %2062 = vtanh.f32 %v2467_v54  ;;  %v1780_v56 = vpop.f32.mrb[10].mxu0 }
 0x102   : > { %v2053_v57 = vpop.eup %2052  ;;  %v2472_v58 = vadd.f32 %v1780_v56, %v2429_v29  ;;  %v416_v59 = vpop.f32.mrb[11].mxu0  ;;  %1804 = vmatmul.mubr.bf16.vlgmr.msra.gmra.mrb[0].mxu1 %v479_v55 }
 0x103   : > { %v2055_v60 = vpop.eup %2054  ;;  %v2475_v61 = vadd.f32 %v2429_v29, %v416_v59  ;;  %1852 = vmatpush3.bf16.msra.mxu1 %v2020_v26 }
 0x104   : > { %2064 = vtanh.f32 %v2472_v58  ;;  %v480_v62 = vpack.c.bf16 %v2053_v57, %v2055_v60  ;;  %1853 = vmatprep.subr.bf16.mxu1 %v2021_v27 }
 0x105   : > { %2066 = vtanh.f32 %v2475_v61  ;;  %v1783_v63 = vpop.f32.mrb[12].mxu0 }
 0x106   : > { %v2057_v0 = vpop.eup %2056  ;;  %v2480_v1 = vadd.f32 %v1783_v63, %v2429_v29  ;;  %v426_v2 = vpop.f32.mrb[13].mxu0  ;;  %1807 = vmatprep.mubr.bf16.mxu1 %v480_v62 }
 0x107   : > { %v2059_v3 = vpop.eup %2058  ;;  %v2483_v4 = vadd.f32 %v2429_v29, %v426_v2  ;;  %1854 = vmatpush3.bf16.msra.mxu1 %v2021_v27 }
 0x108   : > { %2068 = vtanh.f32 %v2480_v1  ;;  %v481_v5 = vpack.c.bf16 %v2057_v0, %v2059_v3  ;;  %1855 = vmatprep.subr.bf16.mxu1 %v2022_v28 }
 0x109   : > { %2070 = vtanh.f32 %v2483_v4  ;;  %v1786_v6 = vpop.f32.mrb[14].mxu0 }
 0x10a   : > { %v2061_v7 = vpop.eup %2060  ;;  %v2488_v8 = vadd.f32 %v1786_v6, %v2429_v29  ;;  %v436_v9 = vpop.f32.mrb[15].mxu0  ;;  %1808 = vmatmul.mubr.bf16.gmra.mrb[4].mxu1 %v481_v5 }
 0x10b   : > { %v2063_v10 = vpop.eup %2062  ;;  %v2491_v11 = vadd.f32 %v2429_v29, %v436_v9  ;;  %v2023_v29 = vld [vmem:[%s2716_s3 + $0x98] sm:$0xff]   ;;  %1856 = vmatpush3.bf16.msra.mxu1 %v2022_v28 }
 0x10c   : > { %2072 = vtanh.f32 %v2488_v8  ;;  %v482_v12 = vpack.c.bf16 %v2061_v7, %v2063_v10  ;;  %1857 = vmatprep.subr.bf16.mxu1 %v2023_v29 }
 0x10d   : > { %2074 = vtanh.f32 %v2491_v11 }
 0x10e   : > { %v2065_v13 = vpop.eup %2064  ;;  %1811 = vmatprep.mubr.bf16.mxu1 %v482_v12 }
 0x10f   : > { %v2067_v14 = vpop.eup %2066  ;;  %1858 = vmatpush3.bf16.msra.mxu1 %v2023_v29 }
 0x110   : > { %v483_v15 = vpack.c.bf16 %v2065_v13, %v2067_v14 }
 0x112   : > { %v2069_v16 = vpop.eup %2068  ;;  %1812 = vmatmul.mubr.bf16.gmra.mrb[8].mxu1 %v483_v15 }
 0x113   : > { %v2071_v17 = vpop.eup %2070 }
 0x114   : > { %v484_v18 = vpack.c.bf16 %v2069_v16, %v2071_v17 }
 0x116   : > { %v2073_v19 = vpop.eup %2072  ;;  %1815 = vmatprep.mubr.bf16.mxu1 %v484_v18 }
 0x117   : > { %v2075_v20 = vpop.eup %2074 }
 0x118   : > { %v485_v21 = vpack.c.bf16 %v2073_v19, %v2075_v20 }
 0x11a   : > { %1816 = vmatmul.mubr.bf16.gmra.mrb[12].mxu1 %v485_v21 }
 0x1d5   : > { %v1805_v32 = vpop.f32.mrb[0].mxu1 }
 0x1d6   : > { %v583_v34 = vadd.f32 %v1805_v32, %v1545_v30  ;;  %v574_v36 = vpop.f32.mrb[1].mxu1 }
 0x1d7   : > { %v575_v38 = vadd.f32 %v1545_v30, %v574_v36  ;;  %v1806_v40 = vpop.f32.mrb[2].mxu1 }
 0x1d8   : > { %2076 = vtanh.f32 %v583_v34  ;;  %v586_v42 = vadd.f32 %v1806_v40, %v1545_v30  ;;  %v577_v43 = vpop.f32.mrb[3].mxu1 }
 0x1d9   : > { %2078 = vtanh.f32 %v575_v38  ;;  %v578_v45 = vadd.f32 %v1545_v30, %v577_v43 }
 0x1da   : > { %2080 = vtanh.f32 %v586_v42 }
 0x1db   : > { %2082 = vtanh.f32 %v578_v45 }
 0x1dd   : > { %v1809_v46 = vpop.f32.mrb[4].mxu1 }
 0x1de   : > { %v599_v48 = vadd.f32 %v1809_v46, %v1545_v30  ;;  %v590_v49 = vpop.f32.mrb[5].mxu1 }
 0x1df   : > { %v591_v50 = vadd.f32 %v1545_v30, %v590_v49  ;;  %v1810_v52 = vpop.f32.mrb[6].mxu1  ;;  %v2026_v49 = vld [vmem:[%s2716_s3 + $0xb0] sm:$0xff]  }
 0x1e0   : > { %2084 = vtanh.f32 %v599_v48  ;;  %v602_v53 = vadd.f32 %v1810_v52, %v1545_v30  ;;  %v593_v55 = vpop.f32.mrb[7].mxu1  ;;  %v2025_v48 = vld [vmem:[%s2716_s3 + $0xa8] sm:$0xff]   ;;  %v2028_v52 = vld [vmem:[%s2716_s3 + $0xc0] sm:$0xff]  }
 0x1e1   : > { %2086 = vtanh.f32 %v591_v50  ;;  %v594_v56 = vadd.f32 %v1545_v30, %v593_v55  ;;  %v2027_v50 = vld [vmem:[%s2716_s3 + $0xb8] sm:$0xff]   ;;  %1883 = vmatprep.subr.bf16.mxu0 %v2028_v52  ;;  %v2030_v55 = vld [vmem:[%s2716_s3 + $0xd0] sm:$0xff]  }
 0x1e2   : > { %v2077_v57 = vpop.eup %2076  ;;  %2088 = vtanh.f32 %v602_v53  ;;  %v2029_v53 = vld [vmem:[%s2716_s3 + $0xc8] sm:$0xff]  }
 0x1e3   : > { %v2079_v59 = vpop.eup %2078  ;;  %2090 = vtanh.f32 %v594_v56  ;;  %v2031_v56 = vld [vmem:[%s2716_s3 + $0xd8] sm:$0xff]  }
 0x1e4   : > { %v2081_v60 = vpop.eup %2080 }
 0x1e5   : > { %v2083_v62 = vpop.eup %2082  ;;  %v1813_v63 = vpop.f32.mrb[8].mxu1  ;;  %v673_v0 = vpack.c.bf16 %v2081_v60, %v2077_v57  ;;  %v1571_v57 = vld [vmem:[%s2717_s4 + $0x1] ss:$0 sm:$0xff] }
 0x1e6   : > { %v615_v2 = vadd.f32 %v1813_v63, %v1545_v30  ;;  %v606_v3 = vpop.f32.mrb[9].mxu1  ;;  %v672_v5 = vpack.c.bf16 %v2083_v62, %v2079_v59 }
 0x1e7   : > { %v607_v6 = vadd.f32 %v1545_v30, %v606_v3  ;;  %v1814_v7 = vpop.f32.mrb[10].mxu1 }
 0x1e8   : > { %2092 = vtanh.f32 %v615_v2  ;;  %v618_v9 = vadd.f32 %v1814_v7, %v1545_v30  ;;  %v609_v10 = vpop.f32.mrb[11].mxu1  ;;  %1835 = vmatprep.mubr.bf16.mxu0 %v672_v5 }
 0x1e9   : > { %2094 = vtanh.f32 %v607_v6  ;;  %v610_v12 = vadd.f32 %v1545_v30, %v609_v10  ;;  %1836 = vmatmul.mubr.bf16.vlgmr.msra.gmra.mrb[16].mxu0 %v673_v0 }
 0x1ea   : > { %v2085_v13 = vpop.eup %2084  ;;  %2096 = vtanh.f32 %v618_v9  ;;  %1884 = vmatpush3.bf16.msra.mxu0 %v2028_v52 }
 0x1eb   : > { %v2087_v14 = vpop.eup %2086  ;;  %2098 = vtanh.f32 %v610_v12  ;;  %1885 = vmatprep.subr.bf16.mxu0 %v2029_v53 }
 0x1ec   : > { %v2089_v15 = vpop.eup %2088 }
 0x1ed   : > { %v2091_v16 = vpop.eup %2090  ;;  %v1817_v17 = vpop.f32.mrb[12].mxu1  ;;  %v675_v18 = vpack.c.bf16 %v2089_v15, %v2085_v13 }
 0x1ee   : > { %v631_v19 = vadd.f32 %v1817_v17, %v1545_v30  ;;  %v622_v20 = vpop.f32.mrb[13].mxu1  ;;  %v674_v21 = vpack.c.bf16 %v2091_v16, %v2087_v14  ;;  %1886 = vmatpush3.bf16.msra.mxu0 %v2029_v53 }
 0x1ef   : > { %v623_v22 = vadd.f32 %v1545_v30, %v622_v20  ;;  %v1818_v23 = vpop.f32.mrb[14].mxu1  ;;  %1887 = vmatprep.subr.bf16.mxu0 %v2030_v55 }
 0x1f0   : > { %2100 = vtanh.f32 %v631_v19  ;;  %v634_v24 = vadd.f32 %v1818_v23, %v1545_v30  ;;  %v625_v25 = vpop.f32.mrb[15].mxu1  ;;  %1839 = vmatprep.mubr.bf16.mxu0 %v674_v21 }
 0x1f1   : > { %2102 = vtanh.f32 %v623_v22  ;;  %v626_v26 = vadd.f32 %v1545_v30, %v625_v25  ;;  %1840 = vmatmul.mubr.bf16.gmra.mrb[20].mxu0 %v675_v18  ;;  %v2024_v30 = vld [vmem:[%s2716_s3 + $0xa0] sm:$0xff]  }
 0x1f2   : > { %v2093_v27 = vpop.eup %2092  ;;  %2104 = vtanh.f32 %v634_v24  ;;  %1859 = vmatprep.subr.bf16.mxu1 %v2024_v30  ;;  %1888 = vmatpush3.bf16.msra.mxu0 %v2030_v55 }
 0x1f3   : > { %v2095_v28 = vpop.eup %2094  ;;  %2106 = vtanh.f32 %v626_v26  ;;  %1860 = vmatpush3.bf16.msra.mxu1 %v2024_v30  ;;  %1889 = vmatprep.subr.bf16.mxu0 %v2031_v56 }
 0x1f4   : > { %v2097_v29 = vpop.eup %2096  ;;  %1861 = vmatprep.subr.bf16.mxu1 %v2025_v48 }
 0x1f5   : > { %v2099_v32 = vpop.eup %2098  ;;  %v677_v34 = vpack.c.bf16 %v2097_v29, %v2093_v27 }
 0x1f6   : > { %v676_v36 = vpack.c.bf16 %v2099_v32, %v2095_v28  ;;  %1890 = vmatpush3.bf16.msra.mxu0 %v2031_v56 }
 0x1f7   : > { %1862 = vmatpush3.bf16.msra.mxu1 %v2025_v48 }
 0x1f8   : > { %1843 = vmatprep.mubr.bf16.mxu0 %v676_v36  ;;  %1863 = vmatprep.subr.bf16.mxu1 %v2026_v49 }
 0x1f9   : > { %1844 = vmatmul.mubr.bf16.gmra.mrb[24].mxu0 %v677_v34 }
 0x1fa   : > { %v2101_v38 = vpop.eup %2100 }
 0x1fb   : > { %v2103_v40 = vpop.eup %2102  ;;  %1864 = vmatpush3.bf16.msra.mxu1 %v2026_v49 }
 0x1fc   : > { %v2105_v42 = vpop.eup %2104  ;;  %1865 = vmatprep.subr.bf16.mxu1 %v2027_v50 }
 0x1fd   : > { %v2107_v43 = vpop.eup %2106  ;;  %v679_v45 = vpack.c.bf16 %v2105_v42, %v2101_v38 }
 0x1fe   : > { %v678_v46 = vpack.c.bf16 %v2107_v43, %v2103_v40 }
 0x1ff   : > { %1866 = vmatpush3.bf16.msra.mxu1 %v2027_v50 }
 0x200   : > { %1847 = vmatprep.mubr.bf16.mxu0 %v678_v46 }
 0x201   : > { %1848 = vmatmul.mubr.bf16.gmra.mrb[28].mxu0 %v679_v45 }
 0x2bc   : > { %v1837_v59 = vpop.f32.mrb[16].mxu0 }
 0x2bd   : > { %v777_v60 = vadd.f32 %v1837_v59, %v1571_v57  ;;  %v768_v62 = vpop.f32.mrb[17].mxu0 }
 0x2be   : > { %v769_v63 = vadd.f32 %v1571_v57, %v768_v62  ;;  %v1838_v0 = vpop.f32.mrb[18].mxu0 }
 0x2bf   : > { %2108 = vtanh.f32 %v777_v60  ;;  %v780_v2 = vadd.f32 %v1838_v0, %v1571_v57  ;;  %v771_v3 = vpop.f32.mrb[19].mxu0 }
 0x2c0   : > { %2110 = vtanh.f32 %v769_v63  ;;  %v772_v5 = vadd.f32 %v1571_v57, %v771_v3 }
 0x2c1   : > { %2112 = vtanh.f32 %v780_v2 }
 0x2c2   : > { %2114 = vtanh.f32 %v772_v5 }
 0x2c4   : > { %v1841_v6 = vpop.f32.mrb[20].mxu0 }
 0x2c5   : > { %v793_v7 = vadd.f32 %v1841_v6, %v1571_v57  ;;  %v784_v9 = vpop.f32.mrb[21].mxu0 }
 0x2c6   : > { %v785_v10 = vadd.f32 %v1571_v57, %v784_v9  ;;  %v1842_v12 = vpop.f32.mrb[22].mxu0  ;;  %v2034_v9 = vld [vmem:[%s2716_s3 + $0xf0] sm:$0xff]  }
 0x2c7   : > { %2116 = vtanh.f32 %v793_v7  ;;  %v796_v13 = vadd.f32 %v1842_v12, %v1571_v57  ;;  %v787_v14 = vpop.f32.mrb[23].mxu0  ;;  %v2033_v7 = vld [vmem:[%s2716_s3 + $0xe8] sm:$0xff]   ;;  %v2036_v12 = vld [vmem:[%s2716_s3 + $0x100] sm:$0xff]  }
 0x2c8   : > { %2118 = vtanh.f32 %v785_v10  ;;  %v788_v15 = vadd.f32 %v1571_v57, %v787_v14  ;;  %v2035_v10 = vld [vmem:[%s2716_s3 + $0xf8] sm:$0xff]   ;;  %1947 = vmatprep.subr.bf16.mxu1 %v2036_v12  ;;  %v2573_v14 = vld [vmem:[%s2716_s3 + $0x110] sm:$0xff]  }
 0x2c9   : > { %v2109_v16 = vpop.eup %2108  ;;  %2120 = vtanh.f32 %v796_v13  ;;  %v2567_v13 = vld [vmem:[%s2716_s3 + $0x108] sm:$0xff]  }
 0x2ca   : > { %v2111_v17 = vpop.eup %2110  ;;  %2122 = vtanh.f32 %v788_v15  ;;  %v2581_v15 = vld [vmem:[%s2717_s4 + $0x2] ss:$0 sm:$0xff] }
 0x2cb   : > { %v2113_v18 = vpop.eup %2112 }
 0x2cc   : > { %v2115_v19 = vpop.eup %2114  ;;  %v1845_v20 = vpop.f32.mrb[24].mxu0  ;;  %v867_v21 = vpack.c.bf16 %v2113_v18, %v2109_v16 }
 0x2cd   : > { %v809_v22 = vadd.f32 %v1845_v20, %v1571_v57  ;;  %v800_v23 = vpop.f32.mrb[25].mxu0  ;;  %v866_v24 = vpack.c.bf16 %v2115_v19, %v2111_v17 }
 0x2ce   : > { %v801_v25 = vadd.f32 %v1571_v57, %v800_v23  ;;  %v1846_v26 = vpop.f32.mrb[26].mxu0 }
 0x2cf   : > { %2124 = vtanh.f32 %v809_v22  ;;  %v812_v27 = vadd.f32 %v1846_v26, %v1571_v57  ;;  %v803_v28 = vpop.f32.mrb[27].mxu0  ;;  %1867 = vmatprep.mubr.bf16.mxu1 %v866_v24 }
 0x2d0   : > { %2126 = vtanh.f32 %v801_v25  ;;  %v804_v29 = vadd.f32 %v1571_v57, %v803_v28  ;;  %1868 = vmatmul.mubr.bf16.vlgmr.msra.gmra.mrb[16].mxu1 %v867_v21 }
 0x2d1   : > { %v2117_v32 = vpop.eup %2116  ;;  %2128 = vtanh.f32 %v812_v27  ;;  %1955 = vmatpush3.bf16.msra.mxu1 %v2036_v12 }
 0x2d2   : > { %v2119_v34 = vpop.eup %2118  ;;  %2130 = vtanh.f32 %v804_v29  ;;  %1948 = vmatprep.subr.bf16.mxu1 %v2567_v13 }
 0x2d3   : > { %v2121_v36 = vpop.eup %2120 }
 0x2d4   : > { %v2123_v38 = vpop.eup %2122  ;;  %v1849_v40 = vpop.f32.mrb[28].mxu0  ;;  %v869_v42 = vpack.c.bf16 %v2121_v36, %v2117_v32 }
 0x2d5   : > { %v825_v43 = vadd.f32 %v1849_v40, %v1571_v57  ;;  %v816_v45 = vpop.f32.mrb[29].mxu0  ;;  %v868_v46 = vpack.c.bf16 %v2123_v38, %v2119_v34  ;;  %1956 = vmatpush3.bf16.msra.mxu1 %v2567_v13 }
 0x2d6   : > { %v817_v30 = vadd.f32 %v1571_v57, %v816_v45  ;;  %v1850_v48 = vpop.f32.mrb[30].mxu0  ;;  %1949 = vmatprep.subr.bf16.mxu1 %v2573_v14 }
 0x2d7   : > { %2132 = vtanh.f32 %v825_v43  ;;  %v828_v49 = vadd.f32 %v1850_v48, %v1571_v57  ;;  %v819_v50 = vpop.f32.mrb[31].mxu0  ;;  %1871 = vmatprep.mubr.bf16.mxu1 %v868_v46 }
 0x2d8   : > { %2134 = vtanh.f32 %v817_v30  ;;  %v820_v52 = vadd.f32 %v1571_v57, %v819_v50  ;;  %1872 = vmatmul.mubr.bf16.gmra.mrb[20].mxu1 %v869_v42  ;;  %v2032_v57 = vld [vmem:[%s2716_s3 + $0xe0] sm:$0xff]  }
 0x2d9   : > { %v2125_v53 = vpop.eup %2124  ;;  %2136 = vtanh.f32 %v828_v49  ;;  %1891 = vmatprep.subr.bf16.mxu0 %v2032_v57  ;;  %1957 = vmatpush3.bf16.msra.mxu1 %v2573_v14 }
 0x2da   : > { %v2127_v55 = vpop.eup %2126  ;;  %2138 = vtanh.f32 %v820_v52  ;;  %1892 = vmatpush3.bf16.msra.mxu0 %v2032_v57 }
 0x2db   : > { %v2129_v56 = vpop.eup %2128  ;;  %1893 = vmatprep.subr.bf16.mxu0 %v2033_v7 }
 0x2dc   : > { %v2131_v59 = vpop.eup %2130  ;;  %v871_v60 = vpack.c.bf16 %v2129_v56, %v2125_v53 }
 0x2dd   : > { %v870_v62 = vpack.c.bf16 %v2131_v59, %v2127_v55 }
 0x2de   : > { %1894 = vmatpush3.bf16.msra.mxu0 %v2033_v7 }
 0x2df   : > { %1875 = vmatprep.mubr.bf16.mxu1 %v870_v62  ;;  %1895 = vmatprep.subr.bf16.mxu0 %v2034_v9 }
 0x2e0   : > { %1876 = vmatmul.mubr.bf16.gmra.mrb[24].mxu1 %v871_v60 }
 0x2e1   : > { %v2133_v63 = vpop.eup %2132 }
 0x2e2   : > { %v2135_v0 = vpop.eup %2134  ;;  %1896 = vmatpush3.bf16.msra.mxu0 %v2034_v9 }
 0x2e3   : > { %v2137_v2 = vpop.eup %2136  ;;  %1897 = vmatprep.subr.bf16.mxu0 %v2035_v10 }
 0x2e4   : > { %v2139_v3 = vpop.eup %2138  ;;  %v873_v5 = vpack.c.bf16 %v2137_v2, %v2133_v63 }
 0x2e5   : > { %v872_v6 = vpack.c.bf16 %v2139_v3, %v2135_v0 }
 0x2e6   : > { %1898 = vmatpush3.bf16.msra.mxu0 %v2035_v10 }
 0x2e7   : > { %1879 = vmatprep.mubr.bf16.mxu1 %v872_v6  ;;  %1915 = vmatprep.subr.bf16.mxu0 %v2036_v12 }
 0x2e8   : > { %1880 = vmatmul.mubr.bf16.gmra.mrb[28].mxu1 %v873_v5 }
 0x3a3   : > { %v1869_v16 = vpop.f32.mrb[16].mxu1 }
 0x3a4   : > { %v971_v17 = vadd.f32 %v1869_v16, %v2581_v15  ;;  %v962_v18 = vpop.f32.mrb[17].mxu1 }
 0x3a5   : > { %v963_v19 = vadd.f32 %v2581_v15, %v962_v18  ;;  %v1870_v20 = vpop.f32.mrb[18].mxu1 }
 0x3a6   : > { %2140 = vtanh.f32 %v971_v17  ;;  %v974_v21 = vadd.f32 %v1870_v20, %v2581_v15  ;;  %v965_v22 = vpop.f32.mrb[19].mxu1 }
 0x3a7   : > { %2142 = vtanh.f32 %v963_v19  ;;  %v966_v23 = vadd.f32 %v2581_v15, %v965_v22 }
 0x3a8   : > { %2144 = vtanh.f32 %v974_v21 }
 0x3a9   : > { %2146 = vtanh.f32 %v966_v23 }
 0x3ab   : > { %v1873_v24 = vpop.f32.mrb[20].mxu1 }
 0x3ac   : > { %v987_v25 = vadd.f32 %v1873_v24, %v2581_v15  ;;  %v978_v26 = vpop.f32.mrb[21].mxu1 }
 0x3ad   : > { %v979_v27 = vadd.f32 %v2581_v15, %v978_v26  ;;  %v1874_v28 = vpop.f32.mrb[22].mxu1  ;;  %v2041_v26 = vld [vmem:[%s2716_s3 + $0x128] sm:$0xff]  }
 0x3ae   : > { %2148 = vtanh.f32 %v987_v25  ;;  %v990_v29 = vadd.f32 %v1874_v28, %v2581_v15  ;;  %v981_v32 = vpop.f32.mrb[23].mxu1  ;;  %v2043_v28 = vld [vmem:[%s2716_s3 + $0x138] sm:$0xff]  }
 0x3af   : > { %2150 = vtanh.f32 %v979_v27  ;;  %v982_v34 = vadd.f32 %v2581_v15, %v981_v32  ;;  %v2042_v27 = vld [vmem:[%s2716_s3 + $0x130] sm:$0xff]  }
 0x3b0   : > { %v2141_v36 = vpop.eup %2140  ;;  %2152 = vtanh.f32 %v990_v29  ;;  %v1623_v29 = vld [vmem:[%s2717_s4 + $0x3] ss:$0 sm:$0xff] }
 0x3b1   : > { %v2143_v38 = vpop.eup %2142  ;;  %2154 = vtanh.f32 %v982_v34 }
 0x3b2   : > { %v2145_v40 = vpop.eup %2144 }
 0x3b3   : > { %v2147_v42 = vpop.eup %2146  ;;  %v1877_v43 = vpop.f32.mrb[24].mxu1  ;;  %v1061_v45 = vpack.c.bf16 %v2145_v40, %v2141_v36 }
 0x3b4   : > { %v1003_v46 = vadd.f32 %v1877_v43, %v2581_v15  ;;  %v994_v30 = vpop.f32.mrb[25].mxu1  ;;  %v1060_v48 = vpack.c.bf16 %v2147_v42, %v2143_v38 }
 0x3b5   : > { %v995_v49 = vadd.f32 %v2581_v15, %v994_v30  ;;  %v1878_v50 = vpop.f32.mrb[26].mxu1 }
 0x3b6   : > { %2156 = vtanh.f32 %v1003_v46  ;;  %v1006_v52 = vadd.f32 %v1878_v50, %v2581_v15  ;;  %v997_v53 = vpop.f32.mrb[27].mxu1  ;;  %1899 = vmatprep.mubr.bf16.mxu0 %v1060_v48 }
 0x3b7   : > { %2158 = vtanh.f32 %v995_v49  ;;  %v998_v55 = vadd.f32 %v2581_v15, %v997_v53  ;;  %1900 = vmatmul.mubr.bf16.vlgmr.msra.gmra.mrb[32].mxu0 %v1061_v45 }
 0x3b8   : > { %v2149_v56 = vpop.eup %2148  ;;  %2160 = vtanh.f32 %v1006_v52  ;;  %1916 = vmatpush3.bf16.msra.mxu0 %v2036_v12 }
 0x3b9   : > { %v2151_v59 = vpop.eup %2150  ;;  %2162 = vtanh.f32 %v998_v55  ;;  %1917 = vmatprep.subr.bf16.mxu0 %v2567_v13 }
 0x3ba   : > { %v2153_v60 = vpop.eup %2152 }
 0x3bb   : > { %v2155_v62 = vpop.eup %2154  ;;  %v1881_v63 = vpop.f32.mrb[28].mxu1  ;;  %v1063_v0 = vpack.c.bf16 %v2153_v60, %v2149_v56 }
 0x3bc   : > { %v1019_v2 = vadd.f32 %v1881_v63, %v2581_v15  ;;  %v1010_v3 = vpop.f32.mrb[29].mxu1  ;;  %v1062_v5 = vpack.c.bf16 %v2155_v62, %v2151_v59  ;;  %1918 = vmatpush3.bf16.msra.mxu0 %v2567_v13 }
 0x3bd   : > { %v1011_v6 = vadd.f32 %v2581_v15, %v1010_v3  ;;  %v1882_v57 = vpop.f32.mrb[30].mxu1  ;;  %1919 = vmatprep.subr.bf16.mxu0 %v2573_v14 }
 0x3be   : > { %2164 = vtanh.f32 %v1019_v2  ;;  %v1022_v7 = vadd.f32 %v1882_v57, %v2581_v15  ;;  %v1013_v9 = vpop.f32.mrb[31].mxu1  ;;  %1903 = vmatprep.mubr.bf16.mxu0 %v1062_v5 }
 0x3bf   : > { %2166 = vtanh.f32 %v1011_v6  ;;  %v1014_v10 = vadd.f32 %v2581_v15, %v1013_v9  ;;  %1904 = vmatmul.mubr.bf16.gmra.mrb[36].mxu0 %v1063_v0  ;;  %v2040_v15 = vld [vmem:[%s2716_s3 + $0x120] sm:$0xff]  }
 0x3c0   : > { %v2157_v12 = vpop.eup %2156  ;;  %2168 = vtanh.f32 %v1022_v7  ;;  %1920 = vmatpush3.bf16.msra.mxu0 %v2573_v14  ;;  %v2039_v14 = vld [vmem:[%s2716_s3 + $0x118] sm:$0xff]  }
 0x3c1   : > { %v2159_v16 = vpop.eup %2158  ;;  %2170 = vtanh.f32 %v1014_v10  ;;  %1921 = vmatprep.subr.bf16.mxu0 %v2039_v14  ;;  %1950 = vmatprep.subr.bf16.mxu1 %v2039_v14 }
 0x3c2   : > { %v2161_v13 = vpop.eup %2160  ;;  %1958 = vmatpush3.bf16.msra.mxu1 %v2039_v14 }
 0x3c3   : > { %v2163_v17 = vpop.eup %2162  ;;  %v1065_v18 = vpack.c.bf16 %v2161_v13, %v2157_v12  ;;  %1951 = vmatprep.subr.bf16.mxu1 %v2040_v15 }
 0x3c4   : > { %v1064_v19 = vpack.c.bf16 %v2163_v17, %v2159_v16  ;;  %1922 = vmatpush3.bf16.msra.mxu0 %v2039_v14 }
 0x3c5   : > { %1923 = vmatprep.subr.bf16.mxu0 %v2040_v15 }
 0x3c6   : > { %1907 = vmatprep.mubr.bf16.mxu0 %v1064_v19  ;;  %1959 = vmatpush3.bf16.msra.mxu1 %v2040_v15 }
 0x3c7   : > { %1908 = vmatmul.mubr.bf16.gmra.mrb[40].mxu0 %v1065_v18  ;;  %1952 = vmatprep.subr.bf16.mxu1 %v2041_v26 }
 0x3c8   : > { %v2165_v20 = vpop.eup %2164  ;;  %1924 = vmatpush3.bf16.msra.mxu0 %v2040_v15 }
 0x3c9   : > { %v2167_v21 = vpop.eup %2166  ;;  %1925 = vmatprep.subr.bf16.mxu0 %v2041_v26 }
 0x3ca   : > { %v2169_v22 = vpop.eup %2168  ;;  %1960 = vmatpush3.bf16.msra.mxu1 %v2041_v26 }
 0x3cb   : > { %v2171_v23 = vpop.eup %2170  ;;  %v1067_v24 = vpack.c.bf16 %v2169_v22, %v2165_v20  ;;  %1953 = vmatprep.subr.bf16.mxu1 %v2042_v27 }
 0x3cc   : > { %v1066_v25 = vpack.c.bf16 %v2171_v23, %v2167_v21  ;;  %1926 = vmatpush3.bf16.msra.mxu0 %v2041_v26 }
 0x3cd   : > { %1927 = vmatprep.subr.bf16.mxu0 %v2042_v27 }
 0x3ce   : > { %1911 = vmatprep.mubr.bf16.mxu0 %v1066_v25  ;;  %1961 = vmatpush3.bf16.msra.mxu1 %v2042_v27 }
 0x3cf   : > { %1912 = vmatmul.mubr.bf16.gmra.mrb[44].mxu0 %v1067_v24  ;;  %1954 = vmatprep.subr.bf16.mxu1 %v2043_v28 }
 0x3d0   : > { %1928 = vmatpush3.bf16.msra.mxu0 %v2042_v27 }
 0x3d1   : > { %1929 = vmatprep.subr.bf16.mxu0 %v2043_v28 }
 0x3d2   : > { %1962 = vmatpush3.bf16.msra.mxu1 %v2043_v28 }
 0x3d4   : > { %1930 = vmatpush3.bf16.msra.mxu0 %v2043_v28 }
 0x48a   : > { %v1901_v32 = vpop.f32.mrb[32].mxu0 }
 0x48b   : > { %v1165_v34 = vadd.f32 %v1901_v32, %v1623_v29  ;;  %v1156_v36 = vpop.f32.mrb[33].mxu0 }
 0x48c   : > { %v1157_v38 = vadd.f32 %v1623_v29, %v1156_v36  ;;  %v1902_v40 = vpop.f32.mrb[34].mxu0 }
 0x48d   : > { %2172 = vtanh.f32 %v1165_v34  ;;  %v1168_v42 = vadd.f32 %v1902_v40, %v1623_v29  ;;  %v1159_v43 = vpop.f32.mrb[35].mxu0 }
 0x48e   : > { %2174 = vtanh.f32 %v1157_v38  ;;  %v1160_v45 = vadd.f32 %v1623_v29, %v1159_v43 }
 0x48f   : > { %2176 = vtanh.f32 %v1168_v42 }
 0x490   : > { %2178 = vtanh.f32 %v1160_v45 }
 0x492   : > { %v1905_v46 = vpop.f32.mrb[36].mxu0 }
 0x493   : > { %v1181_v30 = vadd.f32 %v1905_v46, %v1623_v29  ;;  %v1172_v48 = vpop.f32.mrb[37].mxu0 }
 0x494   : > { %v1173_v49 = vadd.f32 %v1623_v29, %v1172_v48  ;;  %v1906_v50 = vpop.f32.mrb[38].mxu0 }
 0x495   : > { %2180 = vtanh.f32 %v1181_v30  ;;  %v1184_v52 = vadd.f32 %v1906_v50, %v1623_v29  ;;  %v1175_v53 = vpop.f32.mrb[39].mxu0 }
 0x496   : > { %2182 = vtanh.f32 %v1173_v49  ;;  %v1176_v55 = vadd.f32 %v1623_v29, %v1175_v53 }
 0x497   : > { %v2173_v56 = vpop.eup %2172  ;;  %2184 = vtanh.f32 %v1184_v52 }
 0x498   : > { %v2175_v59 = vpop.eup %2174  ;;  %2186 = vtanh.f32 %v1176_v55 }
 0x499   : > { %v2177_v60 = vpop.eup %2176 }
 0x49a   : > { %v2179_v62 = vpop.eup %2178  ;;  %v1909_v63 = vpop.f32.mrb[40].mxu0  ;;  %v1255_v0 = vpack.c.bf16 %v2177_v60, %v2173_v56 }
 0x49b   : > { %v1197_v2 = vadd.f32 %v1909_v63, %v1623_v29  ;;  %v1188_v3 = vpop.f32.mrb[41].mxu0  ;;  %v1254_v5 = vpack.c.bf16 %v2179_v62, %v2175_v59 }
 0x49c   : > { %v1189_v6 = vadd.f32 %v1623_v29, %v1188_v3  ;;  %v1910_v57 = vpop.f32.mrb[42].mxu0 }
 0x49d   : > { %2188 = vtanh.f32 %v1197_v2  ;;  %v1200_v7 = vadd.f32 %v1910_v57, %v1623_v29  ;;  %v1191_v9 = vpop.f32.mrb[43].mxu0  ;;  %1931 = vmatprep.mubr.bf16.mxu0 %v1254_v5 }
 0x49e   : > { %2190 = vtanh.f32 %v1189_v6  ;;  %v1192_v10 = vadd.f32 %v1623_v29, %v1191_v9  ;;  %1932 = vmatmul.mubr.bf16.vlgmr.msra.gmra.mrb[48].mxu0 %v1255_v0 }
 0x49f   : > { %v2181_v12 = vpop.eup %2180  ;;  %2192 = vtanh.f32 %v1200_v7 }
 0x4a0   : > { %v2183_v16 = vpop.eup %2182  ;;  %2194 = vtanh.f32 %v1192_v10 }
 0x4a1   : > { %v2185_v13 = vpop.eup %2184 }
 0x4a2   : > { %v2187_v17 = vpop.eup %2186  ;;  %v1913_v18 = vpop.f32.mrb[44].mxu0  ;;  %v1257_v19 = vpack.c.bf16 %v2185_v13, %v2181_v12 }
 0x4a3   : > { %v1213_v20 = vadd.f32 %v1913_v18, %v1623_v29  ;;  %v1204_v21 = vpop.f32.mrb[45].mxu0  ;;  %v1256_v22 = vpack.c.bf16 %v2187_v17, %v2183_v16 }
 0x4a4   : > { %v1205_v23 = vadd.f32 %v1623_v29, %v1204_v21  ;;  %v1914_v24 = vpop.f32.mrb[46].mxu0 }
 0x4a5   : > { %2196 = vtanh.f32 %v1213_v20  ;;  %v1216_v25 = vadd.f32 %v1914_v24, %v1623_v29  ;;  %v1207_v14 = vpop.f32.mrb[47].mxu0  ;;  %1935 = vmatprep.mubr.bf16.mxu1 %v1256_v22 }
 0x4a6   : > { %2198 = vtanh.f32 %v1205_v23  ;;  %v1208_v15 = vadd.f32 %v1623_v29, %v1207_v14  ;;  %1936 = vmatmul.mubr.bf16.vlgmr.msra.gmra.mrb[32].mxu1 %v1257_v19  ;;  %v1649_v29 = vld [vmem:[%s2717_s4 + $0x4] ss:$0 sm:$0xff] }
 0x4a7   : > { %v2189_v26 = vpop.eup %2188  ;;  %2200 = vtanh.f32 %v1216_v25 }
 0x4a8   : > { %v2191_v27 = vpop.eup %2190  ;;  %2202 = vtanh.f32 %v1208_v15 }
 0x4a9   : > { %v2193_v28 = vpop.eup %2192 }
 0x4aa   : > { %v2195_v32 = vpop.eup %2194  ;;  %v1259_v34 = vpack.c.bf16 %v2193_v28, %v2189_v26 }
 0x4ab   : > { %v1258_v36 = vpack.c.bf16 %v2195_v32, %v2191_v27 }
 0x4ad   : > { %1939 = vmatprep.mubr.bf16.mxu1 %v1258_v36 }
 0x4ae   : > { %1940 = vmatmul.mubr.bf16.gmra.mrb[36].mxu1 %v1259_v34 }
 0x4af   : > { %v2197_v38 = vpop.eup %2196 }
 0x4b0   : > { %v2199_v40 = vpop.eup %2198 }
 0x4b1   : > { %v2201_v42 = vpop.eup %2200 }
 0x4b2   : > { %v2203_v43 = vpop.eup %2202  ;;  %v1261_v45 = vpack.c.bf16 %v2201_v42, %v2197_v38 }
 0x4b3   : > { %v1260_v46 = vpack.c.bf16 %v2203_v43, %v2199_v40 }
 0x4b5   : > { %1943 = vmatprep.mubr.bf16.mxu1 %v1260_v46 }
 0x4b6   : > { %1944 = vmatmul.mubr.bf16.gmra.mrb[40].mxu1 %v1261_v45 }
 0x571   : > { %v1933_v30 = vpop.f32.mrb[48].mxu0 }
 0x572   : > { %v1359_v48 = vadd.f32 %v1933_v30, %v1649_v29  ;;  %v1350_v49 = vpop.f32.mrb[49].mxu0 }
 0x573   : > { %v1351_v50 = vadd.f32 %v1649_v29, %v1350_v49  ;;  %v1934_v52 = vpop.f32.mrb[50].mxu0 }
 0x574   : > { %v1415_v53 = vadd.f32 %v1359_v48, %v2443_v37  ;;  %v1362_v55 = vadd.f32 %v1934_v52, %v1649_v29  ;;  %v1353_v56 = vpop.f32.mrb[51].mxu0 }
 0x575   : > { %v1413_v59 = vadd.f32 %v1351_v50, %v2435_v33  ;;  %v1354_v60 = vadd.f32 %v1649_v29, %v1353_v56 }
 0x576   : > { %1431 = vst [vmem:[%s2629_s10 + $0x10] sm:$0xff] %v1415_v53  ;;  %v1416_v62 = vadd.f32 %v1362_v55, %v2440_v35 }
 0x577   : > { %1429 = vst [vmem:[%s2629_s10] sm:$0xff] %v1413_v59  ;;  %v1414_v63 = vadd.f32 %v1354_v60, %v2432_v31 }
 0x578   : > { %1432 = vst [vmem:[%s2629_s10 + $0x18] sm:$0xff] %v1416_v62 }
 0x579   : > { %1430 = vst [vmem:[%s2629_s10 + $0x8] sm:$0xff] %v1414_v63  ;;  %v1937_v33 = vpop.f32.mrb[32].mxu1 }
 0x57a   : > { %v1375_v37 = vadd.f32 %v1937_v33, %v1649_v29  ;;  %v1366_v0 = vpop.f32.mrb[33].mxu1 }
 0x57b   : > { %v1367_v2 = vadd.f32 %v1649_v29, %v1366_v0  ;;  %v1938_v3 = vpop.f32.mrb[34].mxu1 }
 0x57c   : > { %v1419_v5 = vadd.f32 %v1375_v37, %v2459_v47  ;;  %v1378_v6 = vadd.f32 %v1938_v3, %v1649_v29  ;;  %v1369_v57 = vpop.f32.mrb[35].mxu1 }
 0x57d   : > { %v1417_v7 = vadd.f32 %v1367_v2, %v2451_v41  ;;  %v1370_v35 = vadd.f32 %v1649_v29, %v1369_v57 }
 0x57e   : > { %1435 = vst [vmem:[%s2629_s10 + $0x30] sm:$0xff] %v1419_v5  ;;  %v1420_v31 = vadd.f32 %v1378_v6, %v2456_v44 }
 0x57f   : > { %1433 = vst [vmem:[%s2629_s10 + $0x20] sm:$0xff] %v1417_v7  ;;  %v1418_v9 = vadd.f32 %v1370_v35, %v2448_v39 }
 0x580   : > { %1436 = vst [vmem:[%s2629_s10 + $0x38] sm:$0xff] %v1420_v31 }
 0x581   : > { %1434 = vst [vmem:[%s2629_s10 + $0x28] sm:$0xff] %v1418_v9  ;;  %v1941_v10 = vpop.f32.mrb[36].mxu1 }
 0x582   : > { %v1391_v12 = vadd.f32 %v1941_v10, %v1649_v29  ;;  %v1382_v47 = vpop.f32.mrb[37].mxu1 }
 0x583   : > { %v1383_v16 = vadd.f32 %v1649_v29, %v1382_v47  ;;  %v1942_v13 = vpop.f32.mrb[38].mxu1 }
 0x584   : > { %v1423_v41 = vadd.f32 %v1391_v12, %v2475_v61  ;;  %v1394_v17 = vadd.f32 %v1942_v13, %v1649_v29  ;;  %v1385_v18 = vpop.f32.mrb[39].mxu1 }
 0x585   : > { %v1421_v44 = vadd.f32 %v1383_v16, %v2467_v54  ;;  %v1386_v19 = vadd.f32 %v1649_v29, %v1385_v18 }
 0x586   : > { %1439 = vst [vmem:[%s2629_s10 + $0x50] sm:$0xff] %v1423_v41  ;;  %v1424_v39 = vadd.f32 %v1394_v17, %v2472_v58 }
 0x587   : > { %1437 = vst [vmem:[%s2629_s10 + $0x40] sm:$0xff] %v1421_v44  ;;  %v1422_v20 = vadd.f32 %v1386_v19, %v2464_v51 }
 0x588   : > { %1440 = vst [vmem:[%s2629_s10 + $0x58] sm:$0xff] %v1424_v39 }
 0x589   : > { %1438 = vst [vmem:[%s2629_s10 + $0x48] sm:$0xff] %v1422_v20  ;;  %v1945_v21 = vpop.f32.mrb[40].mxu1 }
 0x58a   : > { %v1407_v22 = vadd.f32 %v1945_v21, %v1649_v29  ;;  %v1398_v61 = vpop.f32.mrb[41].mxu1 }
 0x58b   : > { %v1399_v23 = vadd.f32 %v1649_v29, %v1398_v61  ;;  %v1946_v24 = vpop.f32.mrb[42].mxu1 }
 0x58c   : > { %v1427_v54 = vadd.f32 %v1407_v22, %v2491_v11  ;;  %v1410_v58 = vadd.f32 %v1946_v24, %v1649_v29  ;;  %v1401_v25 = vpop.f32.mrb[43].mxu1 }
 0x58d   : > { %v1425_v51 = vadd.f32 %v1399_v23, %v2483_v4  ;;  %v1402_v14 = vadd.f32 %v1649_v29, %v1401_v25 }
 0x58e   : > { %1443 = vst [vmem:[%s2629_s10 + $0x70] sm:$0xff] %v1427_v54  ;;  %v1428_v15 = vadd.f32 %v1410_v58, %v2488_v8 }
 0x58f   : > { %1441 = vst [vmem:[%s2629_s10 + $0x60] sm:$0xff] %v1425_v51  ;;  %v1426_v11 = vadd.f32 %v1402_v14, %v2480_v1 }
 0x590   : > { %1444 = vst [vmem:[%s2629_s10 + $0x78] sm:$0xff] %v1428_v15 }
 0x591   : > { %1442 = vst [vmem:[%s2629_s10 + $0x68] sm:$0xff] %v1426_v11 }
 0x592   : > { %2217 = shalt.err (!%p2214_p3)
}
 0x593   : > { %s2218_s26 = scalar_lea.hbm %s2662_s15, 2048  ;;  %s2222_s7 = scalar_lea.hbm %s2718_s5, 8192 }
 0x594   : > { %p2219_p4 = scmp.ne.s32.totalorder %s2662_s15, %s2218_s26  ;;  %p2223_p9 = scmp.lt.u32.totalorder %s2662_s15, %s2718_s5 }
 0x595   : > { %p2224_p10 = scmp.lt.u32.totalorder %s2222_s7, %s2218_s26  ;;  %p2226_p12 = scmp.lt.u32.totalorder %s2218_s26, %s2662_s15 }
 0x596   : > { %p2220_p7 = pnand %p2219_p4, %p2339_p5 }
 0x597   : > { %p2225_p11 = por %p2224_p10, %p2223_p9 }
 0x598   : > { %p2221_p8 = pneg %p2220_p7 }
 0x599   : > { %p2227_p13 = por %p2226_p12, %p2225_p11 }
 0x59b   : > { %p2228_p0 = pnand %p2227_p13, %p2221_p8 }
 0x59d   : > { %2231 = shalt.err (!%p2228_p0)
}
 0x59e   : > { %s2269_s10 = smov 128   ;;  %s2270_s11 = smov 8  }
 0x59f   : > { %1963 = dma.vmem_to_hbm [thread:$0]  (%p2339_p5), %s2664_s12, 2048, %s2662_s15, %s2672_s22, %s2269_s10, %s2269_s10, %s2270_s11  }
 0x5a0 PF: > { %p1969_p1 = scmp.ge.s32.totalorder %s2266_s21, 2  ;;  %s1474_s13 = sand.u32 1, %s2254_s18  }
 0x5a1   : > { %s1475_s14 = scalar_lea.sflag [#allocation3], %s1474_s13 }
 0x5a2   : > { %p1966_p2 = pnand %p1969_p1, %p2343_p6 }
 0x5a4   : > { %2249 = dma.done.wait (!%p1966_p2), %s1475_s14, 2048  }
 0x5a5   : > { %2251 = vsyncadd (!%p1966_p2), %s1475_s14, 4294965248  ;;  %p15_p3 = scmp.ge.s32.totalorder %s2326_s24, 6   ;;  %s2721_s18 = smov %s2258_s19 }
 0x5a6   : > { %s2722_s19 = smov %s2262_s20  ;;  %s2723_s20 = smov %s2337_s27 }
 0x5a7   : > { %s2724_s21 = smov %s2326_s24  ;;  %17 = sbr.rel (!%p15_p3) target bundleno = 3 (0x3), region = 83 }
 0x5ae   :  { %1480 = vsyncpa [#allocation3], 1 }
 0x5af   :  { %1482 = vsyncpa [#allocation3 + $0x1], 1 }

</bundles_post_ra>
